<compile_context>
chip_gen: v5e
topology: v5e:2x2
jax: 0.10.0
libtpu: 0.0.40
codegen_flags: <defaults>
</compile_context>

<pallas_src>
import math
from functools import partial

import numpy as np
import jax
import jax.numpy as jnp
from jax.experimental import pallas as pl
from jax.experimental.pallas import tpu as pltpu


def _causal_conv_kernel(x_ref, xloc_ref, w_cat_ref, b_conv_ref,
                        w_os_ref, b_os_ref, out_ref, skip_ref, carry_ref,
                        *, shifts, c_res):
    t = pl.program_id(1)

    # Zero the causal-halo carry at the start of each batch row's time sweep.
    @pl.when(t == 0)
    def _():
        carry_ref[...] = jnp.zeros_like(carry_ref)

    cur = x_ref[0]                 # (Cres, T_tile), input dtype, time on lanes
    prev = carry_ref[...]          # previous time tile (zeros on first tile)
    t_tile = cur.shape[1]

    # im2col for the dilated causal conv: tap k needs x[t - shift_k]; lanes
    # that fall before this tile come from the carried previous tile.
    pieces = []
    for s in shifts:               # static Python ints, s = (K-1-k)*dilation
        if s == 0:
            pieces.append(cur)
        else:
            pieces.append(jnp.concatenate(
                [prev[:, t_tile - s:], cur[:, :t_tile - s]], axis=1))
    pieces.append(xloc_ref[0])     # (Cloc, T_tile) local conditioning
    x_cat = jnp.concatenate(pieces, axis=0)          # (K*Cres + Cloc, T_tile)

    # Fused dilated conv + local 1x1 conv: one MXU contraction, bf16 in / f32 acc.
    pre = jnp.dot(w_cat_ref[...], x_cat.astype(jnp.bfloat16),
                  preferred_element_type=jnp.float32)
    pre = pre + b_conv_ref[...]                      # (Cgate, 1) broadcast

    gh = pre.shape[0] // 2
    gated = jnp.tanh(pre[:gh, :]) * jax.nn.sigmoid(pre[gh:, :])   # f32 VPU/EUP

    # Fused out/skip 1x1 convs: one MXU contraction, then split along sublanes.
    os = jnp.dot(w_os_ref[...], gated.astype(jnp.bfloat16),
                 preferred_element_type=jnp.float32)
    os = os + b_os_ref[...]                          # (2*Cres, 1) broadcast

    out = (os[:c_res, :] + cur.astype(jnp.float32)) * jnp.float32(math.sqrt(0.5))
    out_ref[0] = out.astype(out_ref.dtype)
    skip_ref[0] = os[c_res:, :].astype(skip_ref.dtype)

    # Carry this tile so the next time tile can read its causal halo from VMEM.
    carry_ref[...] = cur


def causal_conv_forward(x, x_local, params, *, kernel_size, dilation, t_tile=128):
    """x, x_local in PyTorch NCL layout (B, C, T). Returns (out, skip) in NCL."""
    B, c_res, T = x.shape
    _, c_loc, _ = x_local.shape
    pad = (kernel_size - 1) * dilation
    assert T % t_tile == 0, "T must be a multiple of the time tile"
    assert pad <= t_tile, "causal halo must fit in one previous time tile"

    # Fuse weights at trace time (tiny): conv taps + local 1x1 share one
    # contraction; out/skip 1x1 share another. Matmul operands in bf16.
    w_taps = [params['w_conv'][:, :, k] for k in range(kernel_size)]
    w_cat = jnp.concatenate(w_taps + [params['w_loc'][:, :, 0]],
                            axis=1).astype(jnp.bfloat16)          # (Cgate, K*Cres+Cloc)
    b_conv = params['b_conv'].astype(jnp.float32)[:, None]        # (Cgate, 1)
    w_os = jnp.concatenate([params['w_out'][:, :, 0],
                            params['w_skip'][:, :, 0]],
                           axis=0).astype(jnp.bfloat16)           # (2*Cres, Gh)
    b_os = jnp.concatenate([params['b_out'], params['b_skip']],
                           axis=0).astype(jnp.float32)[:, None]   # (2*Cres, 1)

    shifts = tuple((kernel_size - 1 - k) * dilation for k in range(kernel_size))

    kernel = partial(_causal_conv_kernel, shifts=shifts, c_res=c_res)
    out, skip = pl.pallas_call(
        kernel,
        out_shape=(jax.ShapeDtypeStruct((B, c_res, T), x.dtype),
                   jax.ShapeDtypeStruct((B, c_res, T), x.dtype)),
        grid=(B, T // t_tile),
        in_specs=[
            pl.BlockSpec((1, c_res, t_tile), lambda b, t: (b, 0, t)),
            pl.BlockSpec((1, c_loc, t_tile), lambda b, t: (b, 0, t)),
            pl.BlockSpec(w_cat.shape, lambda b, t: (0, 0)),
            pl.BlockSpec(b_conv.shape, lambda b, t: (0, 0)),
            pl.BlockSpec(w_os.shape, lambda b, t: (0, 0)),
            pl.BlockSpec(b_os.shape, lambda b, t: (0, 0)),
        ],
        out_specs=(
            pl.BlockSpec((1, c_res, t_tile), lambda b, t: (b, 0, t)),
            pl.BlockSpec((1, c_res, t_tile), lambda b, t: (b, 0, t)),
        ),
        scratch_shapes=[pltpu.VMEM((c_res, t_tile), x.dtype)],
        compiler_params=pltpu.CompilerParams(
            dimension_semantics=("parallel", "arbitrary")),
    )(x, x_local, w_cat, b_conv, w_os, b_os)
    return out, skip


def _reference_forward(x, x_local, params, kernel_size, dilation):
    """Pure-JAX f32 reference with the same (inference-mode) semantics."""
    pad = (kernel_size - 1) * dilation
    gh = params['w_conv'].shape[0] // 2
    conv = jax.lax.conv_general_dilated(
        x, params['w_conv'], window_strides=(1,), padding=[(pad, pad)],
        rhs_dilation=(dilation,), dimension_numbers=('NCH', 'OIH', 'NCH'))
    conv = conv + params['b_conv'][None, :, None]
    conv = conv[:, :, :x.shape[-1]]
    c = jnp.einsum('blt,gl->bgt', x_local, params['w_loc'][:, :, 0])
    a = conv[:, :gh, :] + c[:, :gh, :]
    b = conv[:, gh:, :] + c[:, gh:, :]
    gated = jnp.tanh(a) * jax.nn.sigmoid(b)
    skip = jnp.einsum('bgt,rg->brt', gated, params['w_skip'][:, :, 0]) \
        + params['b_skip'][None, :, None]
    out = jnp.einsum('bgt,rg->brt', gated, params['w_out'][:, :, 0]) \
        + params['b_out'][None, :, None]
    out = (out + x) * math.sqrt(0.5)
    return out, skip


if __name__ == "__main__":
    B, T = 2, 256
    residual_channels, gate_channels, local_channels = 8, 16, 6
    kernel_size, dilation = 3, 2
    gate_out_channels = gate_channels // 2

    key = jax.random.PRNGKey(0)
    ks = jax.random.split(key, 9)
    params = {
        'w_conv': 0.1 * jax.random.normal(
            ks[0], (gate_channels, residual_channels, kernel_size), jnp.float32),
        'b_conv': 0.1 * jax.random.normal(ks[1], (gate_channels,), jnp.float32),
        'w_loc': 0.1 * jax.random.normal(
            ks[2], (gate_channels, local_channels, 1), jnp.float32),
        'w_out': 0.1 * jax.random.normal(
            ks[3], (residual_channels, gate_out_channels, 1), jnp.float32),
        'b_out': 0.1 * jax.random.normal(ks[4], (residual_channels,), jnp.float32),
        'w_skip': 0.1 * jax.random.normal(
            ks[5], (residual_channels, gate_out_channels, 1), jnp.float32),
        'b_skip': 0.1 * jax.random.normal(ks[6], (residual_channels,), jnp.float32),
    }
    x = jax.random.normal(ks[7], (B, residual_channels, T), jnp.float32)
    x_local = jax.random.normal(ks[8], (B, local_channels, T), jnp.float32)

    out, skip = causal_conv_forward(
        x, x_local, params, kernel_size=kernel_size, dilation=dilation)
    out = jax.block_until_ready(out)
    skip = jax.block_until_ready(skip)

    ref_out, ref_skip = _reference_forward(x, x_local, params, kernel_size, dilation)
    assert out.shape == (B, residual_channels, T)
    assert skip.shape == (B, residual_channels, T)
    np.testing.assert_allclose(np.asarray(out), np.asarray(ref_out),
                               rtol=2e-2, atol=2e-2)
    np.testing.assert_allclose(np.asarray(skip), np.asarray(ref_skip),
                               rtol=2e-2, atol=2e-2)
    print("KERNEL_OK")
</pallas_src>

<mosaic_0001>
module attributes {stable_mosaic.version = 11 : i64} {
  func.func @_causal_conv_kernel(%arg0: i32, %arg1: i32, %arg2: memref<1x8x128xf32, #tpu.memory_space<vmem>>, %arg3: memref<1x6x128xf32, #tpu.memory_space<vmem>>, %arg4: memref<16x30xbf16, #tpu.memory_space<vmem>>, %arg5: memref<16x1xf32, #tpu.memory_space<vmem>>, %arg6: memref<16x8xbf16, #tpu.memory_space<vmem>>, %arg7: memref<16x1xf32, #tpu.memory_space<vmem>>, %arg8: memref<1x8x128xf32, #tpu.memory_space<vmem>>, %arg9: memref<1x8x128xf32, #tpu.memory_space<vmem>>, %arg10: memref<8x128xf32, #tpu.memory_space<vmem>>) attributes {dimension_semantics = [#tpu.dimension_semantics<parallel>, #tpu.dimension_semantics<arbitrary>], iteration_bounds = array<i64: 2, 2>, scalar_prefetch = 0 : i64, scratch_operands = 1 : i64, tpu.core_type = #tpu.core_type<tc>, window_params = [{transform_indices = @transform_0, window_bounds = array<i64: 1, 8, 128>}, {transform_indices = @transform_1, window_bounds = array<i64: 1, 6, 128>}, {pipeline_mode = #tpu.pipeline_mode<synchronous>, transform_indices = @transform_2, window_bounds = array<i64: 16, 30>}, {pipeline_mode = #tpu.pipeline_mode<synchronous>, transform_indices = @transform_3, window_bounds = array<i64: 16, 1>}, {pipeline_mode = #tpu.pipeline_mode<synchronous>, transform_indices = @transform_4, window_bounds = array<i64: 16, 8>}, {pipeline_mode = #tpu.pipeline_mode<synchronous>, transform_indices = @transform_5, window_bounds = array<i64: 16, 1>}, {transform_indices = @transform_6, window_bounds = array<i64: 1, 8, 128>}, {transform_indices = @transform_7, window_bounds = array<i64: 1, 8, 128>}]} {
    %c0_i32 = arith.constant 0 : i32
    %0 = arith.cmpi eq, %arg1, %c0_i32 : i32
    %1 = arith.extui %0 : i1 to i32
    %c0_i32_0 = arith.constant 0 : i32
    %2 = arith.cmpi ne, %1, %c0_i32_0 : i32
    scf.if %2 {
      %cst_27 = arith.constant 0.000000e+00 : f32
      %48 = vector.broadcast %cst_27 : f32 to vector<8x128xf32>
      %c0_28 = arith.constant 0 : index
      %c0_29 = arith.constant 0 : index
      %49 = vector.load %arg10[%c0_28, %c0_29] : memref<8x128xf32, #tpu.memory_space<vmem>>, vector<8x128xf32>
      tpu.vector_store %arg10[%c0_28, %c0_29], %48 {strides = array<i32>} : memref<8x128xf32, #tpu.memory_space<vmem>>, vector<8x128xf32>,
    } else {
    }
    %c0 = arith.constant 0 : index
    %c0_1 = arith.constant 0 : index
    %c0_2 = arith.constant 0 : index
    %3 = vector.load %arg2[%c0, %c0_1, %c0_2] : memref<1x8x128xf32, #tpu.memory_space<vmem>>, vector<1x8x128xf32>
    %4 = vector.shape_cast %3 : vector<1x8x128xf32> to vector<8x128xf32>
    %c0_3 = arith.constant 0 : index
    %c0_4 = arith.constant 0 : index
    %5 = vector.load %arg10[%c0_3, %c0_4] : memref<8x128xf32, #tpu.memory_space<vmem>>, vector<8x128xf32>
    %6 = vector.extract_strided_slice %5 {offsets = [0, 124], sizes = [8, 4], strides = [1, 1]} : vector<8x128xf32> to vector<8x4xf32>
    %7 = vector.extract_strided_slice %4 {offsets = [0, 0], sizes = [8, 124], strides = [1, 1]} : vector<8x128xf32> to vector<8x124xf32>
    %8 = tpu.concatenate %6, %7 in 1 : vector<8x4xf32>, vector<8x124xf32> -> vector<8x128xf32>
    %9 = vector.extract_strided_slice %5 {offsets = [0, 126], sizes = [8, 2], strides = [1, 1]} : vector<8x128xf32> to vector<8x2xf32>
    %10 = vector.extract_strided_slice %4 {offsets = [0, 0], sizes = [8, 126], strides = [1, 1]} : vector<8x128xf32> to vector<8x126xf32>
    %11 = tpu.concatenate %9, %10 in 1 : vector<8x2xf32>, vector<8x126xf32> -> vector<8x128xf32>
    %c0_5 = arith.constant 0 : index
    %c0_6 = arith.constant 0 : index
    %c0_7 = arith.constant 0 : index
    %12 = vector.load %arg3[%c0_5, %c0_6, %c0_7] : memref<1x6x128xf32, #tpu.memory_space<vmem>>, vector<1x6x128xf32>
    %13 = vector.shape_cast %12 : vector<1x6x128xf32> to vector<6x128xf32>
    %14 = tpu.concatenate %8, %11, %4, %13 in 0 : vector<8x128xf32>, vector<8x128xf32>, vector<8x128xf32>, vector<6x128xf32> -> vector<30x128xf32>
    %c0_8 = arith.constant 0 : index
    %c0_9 = arith.constant 0 : index
    %15 = vector.load %arg4[%c0_8, %c0_9] : memref<16x30xbf16, #tpu.memory_space<vmem>>, vector<16x30xbf16>
    %16 = arith.truncf %14 : vector<30x128xf32> to vector<30x128xbf16>
    %cst = arith.constant dense<0.000000e+00> : vector<16x128xf32>
    %17 = tpu.matmul %15, %16, %cst {dimension_numbers = #tpu.dot_dimension_numbers<[1], [0], [0], [1], [0, 0, 1, 1], [], []>} : vector<16x30xbf16>, vector<30x128xbf16>, vector<16x128xf32> -> vector<16x128xf32>
    %c0_10 = arith.constant 0 : index
    %c0_11 = arith.constant 0 : index
    %18 = vector.load %arg5[%c0_10, %c0_11] : memref<16x1xf32, #tpu.memory_space<vmem>>, vector<16x1xf32>
    %19 = vector.broadcast %18 : vector<16x1xf32> to vector<16x128xf32>
    %20 = arith.addf %17, %19 : vector<16x128xf32>
    %21 = vector.extract_strided_slice %20 {offsets = [0, 0], sizes = [8, 128], strides = [1, 1]} : vector<16x128xf32> to vector<8x128xf32>
    %22 = math.tanh %21 : vector<8x128xf32>
    %23 = vector.extract_strided_slice %20 {offsets = [8, 0], sizes = [8, 128], strides = [1, 1]} : vector<16x128xf32> to vector<8x128xf32>
    %24 = arith.negf %23 : vector<8x128xf32>
    %25 = math.exp %24 : vector<8x128xf32>
    %cst_12 = arith.constant 1.000000e+00 : f32
    %26 = vector.broadcast %cst_12 : f32 to vector<8x128xf32>
    %27 = arith.addf %26, %25 : vector<8x128xf32>
    %28 = arith.divf %26, %27 : vector<8x128xf32>
    %29 = arith.mulf %22, %28 : vector<8x128xf32>
    %c0_13 = arith.constant 0 : index
    %c0_14 = arith.constant 0 : index
    %30 = vector.load %arg6[%c0_13, %c0_14] : memref<16x8xbf16, #tpu.memory_space<vmem>>, vector<16x8xbf16>
    %31 = arith.truncf %29 : vector<8x128xf32> to vector<8x128xbf16>
    %cst_15 = arith.constant dense<0.000000e+00> : vector<16x128xf32>
    %32 = tpu.matmul %30, %31, %cst_15 {dimension_numbers = #tpu.dot_dimension_numbers<[1], [0], [0], [1], [0, 0, 1, 1], [], []>} : vector<16x8xbf16>, vector<8x128xbf16>, vector<16x128xf32> -> vector<16x128xf32>
    %c0_16 = arith.constant 0 : index
    %c0_17 = arith.constant 0 : index
    %33 = vector.load %arg7[%c0_16, %c0_17] : memref<16x1xf32, #tpu.memory_space<vmem>>, vector<16x1xf32>
    %34 = vector.broadcast %33 : vector<16x1xf32> to vector<16x128xf32>
    %35 = arith.addf %32, %34 : vector<16x128xf32>
    %36 = vector.extract_strided_slice %35 {offsets = [0, 0], sizes = [8, 128], strides = [1, 1]} : vector<16x128xf32> to vector<8x128xf32>
    %37 = arith.addf %36, %4 : vector<8x128xf32>
    %cst_18 = arith.constant 0.707106769 : f32
    %38 = vector.broadcast %cst_18 : f32 to vector<8x128xf32>
    %39 = arith.mulf %37, %38 : vector<8x128xf32>
    %c0_19 = arith.constant 0 : index
    %c0_20 = arith.constant 0 : index
    %c0_21 = arith.constant 0 : index
    %40 = vector.load %arg8[%c0_19, %c0_20, %c0_21] : memref<1x8x128xf32, #tpu.memory_space<vmem>>, vector<1x8x128xf32>
    %41 = vector.shape_cast %40 : vector<1x8x128xf32> to vector<8x128xf32>
    %42 = vector.shape_cast %39 : vector<8x128xf32> to vector<1x8x128xf32>
    tpu.vector_store %arg8[%c0_19, %c0_20, %c0_21], %42 {strides = array<i32>} : memref<1x8x128xf32, #tpu.memory_space<vmem>>, vector<1x8x128xf32>,
    %43 = vector.extract_strided_slice %35 {offsets = [8, 0], sizes = [8, 128], strides = [1, 1]} : vector<16x128xf32> to vector<8x128xf32>
    %c0_22 = arith.constant 0 : index
    %c0_23 = arith.constant 0 : index
    %c0_24 = arith.constant 0 : index
    %44 = vector.load %arg9[%c0_22, %c0_23, %c0_24] : memref<1x8x128xf32, #tpu.memory_space<vmem>>, vector<1x8x128xf32>
    %45 = vector.shape_cast %44 : vector<1x8x128xf32> to vector<8x128xf32>
    %46 = vector.shape_cast %43 : vector<8x128xf32> to vector<1x8x128xf32>
    tpu.vector_store %arg9[%c0_22, %c0_23, %c0_24], %46 {strides = array<i32>} : memref<1x8x128xf32, #tpu.memory_space<vmem>>, vector<1x8x128xf32>,
    %c0_25 = arith.constant 0 : index
    %c0_26 = arith.constant 0 : index
    %47 = vector.load %arg10[%c0_25, %c0_26] : memref<8x128xf32, #tpu.memory_space<vmem>>, vector<8x128xf32>
    tpu.vector_store %arg10[%c0_25, %c0_26], %4 {strides = array<i32>} : memref<8x128xf32, #tpu.memory_space<vmem>>, vector<8x128xf32>,
    return
  }
  func.func @transform_0(%arg0: i32, %arg1: i32) -> (i32, i32, i32) {
    %c0_i32 = arith.constant 0 : i32
    %c0_i32_0 = arith.constant 0 : i32
    return %arg0, %c0_i32, %arg1 : i32, i32, i32
  }
  func.func @transform_1(%arg0: i32, %arg1: i32) -> (i32, i32, i32) {
    %c0_i32 = arith.constant 0 : i32
    %c0_i32_0 = arith.constant 0 : i32
    return %arg0, %c0_i32, %arg1 : i32, i32, i32
  }
  func.func @transform_2(%arg0: i32, %arg1: i32) -> (i32, i32) {
    %c0_i32 = arith.constant 0 : i32
    %c0_i32_0 = arith.constant 0 : i32
    %c0_i32_1 = arith.constant 0 : i32
    return %c0_i32, %c0_i32_0 : i32, i32
  }
  func.func @transform_3(%arg0: i32, %arg1: i32) -> (i32, i32) {
    %c0_i32 = arith.constant 0 : i32
    %c0_i32_0 = arith.constant 0 : i32
    %c0_i32_1 = arith.constant 0 : i32
    return %c0_i32, %c0_i32_0 : i32, i32
  }
  func.func @transform_4(%arg0: i32, %arg1: i32) -> (i32, i32) {
    %c0_i32 = arith.constant 0 : i32
    %c0_i32_0 = arith.constant 0 : i32
    %c0_i32_1 = arith.constant 0 : i32
    return %c0_i32, %c0_i32_0 : i32, i32
  }
  func.func @transform_5(%arg0: i32, %arg1: i32) -> (i32, i32) {
    %c0_i32 = arith.constant 0 : i32
    %c0_i32_0 = arith.constant 0 : i32
    %c0_i32_1 = arith.constant 0 : i32
    return %c0_i32, %c0_i32_0 : i32, i32
  }
  func.func @transform_6(%arg0: i32, %arg1: i32) -> (i32, i32, i32) {
    %c0_i32 = arith.constant 0 : i32
    %c0_i32_0 = arith.constant 0 : i32
    return %arg0, %c0_i32, %arg1 : i32, i32, i32
  }
  func.func @transform_7(%arg0: i32, %arg1: i32) -> (i32, i32, i32) {
    %c0_i32 = arith.constant 0 : i32
    %c0_i32_0 = arith.constant 0 : i32
    return %arg0, %c0_i32, %arg1 : i32, i32, i32
  }
}

</mosaic_0001>

<bundles_post_ra>
// kernel: tpu_custom_call.1
= control target key start
LH: loop header
LB: loop body
LE: loop exit
PB: predicated region body
PF: predicated region fallthrough
CT: control target
= control target key end

     0   :  { %13 = vsyncpa [#allocation4], 0  ;;  %s1134_s0 = inlined_call_operand.vmem [shape: f32[2,8,256], index: 0, kind: input, shape index: {}]   ;;  %s1135_s1 = inlined_call_operand.vmem [shape: f32[2,6,256], index: 1, kind: input, shape index: {}]   ;;  %s1136_s2 = inlined_call_operand.vmem [shape: bf16[16,30], index: 2, kind: input, shape index: {}]   ;;  %s1137_s3 = inlined_call_operand.vmem [shape: f32[16,1], index: 3, kind: input, shape index: {}]   ;;  %s1138_s4 = inlined_call_operand.vmem [shape: bf16[16,8], index: 4, kind: input, shape index: {}]   ;;  %s1139_s5 = inlined_call_operand.vmem [shape: f32[16,1], index: 5, kind: input, shape index: {}]   ;;  %s1140_s6 = inlined_call_operand.hbm [shape: f32[2,8,256], index: 6, kind: output, shape index: {0}]   ;;  %s1141_s7 = inlined_call_operand.hbm [shape: f32[2,8,256], index: 7, kind: output, shape index: {1}]  }
   0x1   :  { %15 = vsyncpa [#allocation4 + $0x1], 0 }
   0x2   :  { %16 = vsyncpa [#allocation6], 0 }
   0x3   :  { %18 = vsyncpa [#allocation6 + $0x1], 0  ;;  %s958_s24 = smov 0   ;;  %s960_s25 = smov 0  }
   0x4   :  { %s962_s26 = smov 0   ;;  %s964_s27 = smov 0  }
   0x5   :  { %s966_s28 = smov 0   ;;  %s968_s29 = smov 0  }
   0x6   :  { %s970_s30 = smov 0   ;;  %s972_s8 = smov 0  }
   0x7 LB: > { %1146 = sst [smem:[#allocation9_spill]] %s904_s29  ;;  %s654_s9 = sadd.s32 4294967295, %s912_s8   ;;  %s912_s8 = sphi %s972_s8, %s24_s8   ;;  %s908_s30 = sphi %s970_s30, %s1157_s30   ;;  %s904_s29 = sphi %s968_s29, %s1156_s29   ;;  %s900_s28 = sphi %s966_s28, %s1155_s28   ;;  %s896_s27 = sphi %s964_s27, %s1154_s27   ;;  %s892_s26 = sphi %s962_s26, %s1160_s26   ;;  %s888_s25 = sphi %s960_s25, %s1159_s25   ;;  %s884_s24 = sphi %s958_s24, %s1158_s24  }
   0x8   : > { %1147 = sst [smem:[#allocation10_spill]] %s908_s30  ;;  %s655_s10 = sadd.s32 4294967294, %s912_s8  }
   0x9   : > { %s33_s11 = sadd.s32 1, %s904_s29  ;;  %s36_s12 = sadd.s32 1, %s908_s30 }
   0xa   : > { %p34_p0 = scmp.ge.s32.totalorder %s33_s11, 2  ;;  %p195_p1 = scmp.ne.s32.totalorder %s892_s26, %s888_s25 }
   0xb   : > { %p196_p2 = scmp.eq.s32.totalorder %s654_s9, 3  ;;  %p201_p5 = scmp.ne.s32.totalorder %s888_s25, %s884_s24 }
   0xc   : > { %s1162_s11 = smov (%p34_p0, %s33_s11), 0  ;;  %s1164_s12 = smov (!%p34_p0, %s36_s12), %s908_s30 }
   0xd   : > { %1148 = sst [smem:[#allocation11_spill]] %s1162_s11  ;;  %s181_s13 = ssub.s32 %s904_s29, %s1162_s11 }
   0xe   : > { %p1009_p3 = por %p196_p2, %p195_p1  ;;  %p38_p4 = scmp.ge.s32.totalorder %s1164_s12, 2 }
   0xf   : > { %p202_p6 = scmp.eq.s32.totalorder %s655_s10, 3  ;;  %p658_p7 = scmp.ge.s32.totalorder %s912_s8, 1 }
  0x10   : > { %s1166_s12 = smov (%p38_p4, %s1164_s12), 0  ;;  %p282_p9 = scmp.lt.s32.totalorder %s912_s8, 5 }
  0x11   : > { %1150 = sst [smem:[#allocation12_spill]] %s1166_s12  ;;  %p1018_p8 = por %p202_p6, %p201_p5 }
  0x12   : > { %s180_s16 = ssub.s32 %s908_s30, %s1166_s12  ;;  %s185_s17 = sadd.s32 1, %s892_s26 }
  0x13   : > { %s182_s18 = sor.u32 %s181_s13, %s180_s16  ;;  %p283_p10 = pnand %p658_p7, %p282_p9 }
  0x14   : > { %p183_p11 = scmp.eq.s32.totalorder %s182_s18, 0  ;;  %s1030_s20 = sand.u32 (!%p283_p10), 1, %s888_s25  }
  0x15   : > { %286 = sbr.rel (%p283_p10) target bundleno = 495 (0x1ef), region = 44  ;;  %p330_p12 = scmp.lt.s32.totalorder (!%p283_p10), %s900_s28, 1 }
  0x16   : > { %s1027_s19 = scalar_select %p183_p11, %s892_s26, %s185_s17  }
  0x17   : > { %s659_s21 = sshll.u32 (!%p283_p10), %s1030_s20, 3  ;;  %p332_p13 = scmp.lt.s32.totalorder (!%p283_p10), %s896_s27, 1 }
  0x18   : > { %1152 = sst [smem:[#allocation13_spill]] %s1027_s19  ;;  %s1043_s29 = scalar_lea.vmem (!%p283_p10), [#allocation3], %s659_s21 }
  0x19   : > { %s1045_s19 = scalar_lea.vmem (!%p283_p10), [#allocation5], %s659_s21  ;;  %p665_p0 = scmp.ne.s32.totalorder (!%p283_p10), %s896_s27, 0 }
  0x1a   : > { %s331_s22 = scalar_select %p330_p12, %s900_s28, 1 }
  0x1b   : > { %s333_s23 = scalar_select %p332_p13, %s896_s27, 1 }
  0x1c   : > { %s661_s9 = sshll.u32 %s331_s22, 1  ;;  %350 = sbr.rel (%p665_p0) target bundleno = 35 (0x23), region = 48 }
  0x1d   : > { %s335_s10 = sadd.s32 %s661_s9, %s333_s23 }
  0x1e   : > { %s662_s13 = sshll.u32 %s335_s10, 3 }
  0x1f   : > { %s337_s18 = scalar_lea.vmem %s1134_s0, %s662_s13  ;;  %s345_s30 = scalar_lea.vmem %s1135_s1, %s662_s13 }
  0x21   : > { %v914_v0 = vmov 0.0  }
  0x22   : > { %351 = vst [vmem:[#allocation2] sm:$0xff] %v914_v0 }
  0x23 PF: > { %v1048_v1 = vld [vmem:[%s337_s18] sm:$0xff]  ;;  %s915_s22 = smov 4   ;;  %s916_s11 = smov 2   ;;  %vm398_vm0 = vcmask 1046528   ;;  %v378_v7 = vld [vmem:[%s1137_s3 + $0x8] sm:$0xff]  ;;  %v917_v8 = vmov 0  }
  0x24   : > { %v372_v4 = vld [vmem:[%s345_s30] sm:$0x3f]  ;;  %777 = vset.pattern.permute.xlu1 %v917_v8  ;;  %778 = vset.pattern.permute.xlu2 %v917_v8  ;;  %vm362_vm1 = vcmask 31744   ;;  %vm370_vm2 = vcmask 15360   ;;  %vm394_vm3 = vcmask 244736   ;;  %v441_v28 = vld [vmem:[%s1139_s5 + $0x8] sm:$0xff] }
  0x25   : > { %v376_v5 = vpack.c.bf16 %v372_v4, %v1048_v1  ;;  %386 = vperm.xlu1 %777, %v378_v7   ;;  %779 = vset.pattern.permute.xlu0 %v917_v8  ;;  %v377_v9 = vld [vmem:[%s1137_s3] sm:$0xff]  ;;  %vm461_vm8 = vcmask 1043456   ;;  %vm457_vm9 = vcmask 64512   ;;  %s679_s12 = sshll.u32 %s900_s28, 1  ;;  %s504_s13 = sshll.u32 %s1043_s29, 4  ;;  %s505_s13 = int_to_ptr.vmem [resolvable:$true] %s504_s13 }
  0x26   : > { %v685_v19 = vld [vmem:[%s1136_s2] sm:$0xff]  ;;  %s500_s21 = sadd.s32 %s896_s27, %s679_s12  ;;  %s520_s27 = sshll.u32 %s1045_s19, 4  ;;  %s521_s27 = int_to_ptr.vmem [resolvable:$true] %s520_s27 }
  0x27   : > { %v400_v6 = vsel %vm398_vm0, %v376_v5, 0  ;;  %v440_v25 = vld [vmem:[%s1139_s5] sm:$0xff]  ;;  %s680_s23 = sshll.u32 %s500_s21, 3 }
  0x28   : > { %408 = vmatpush.bf16.msra.mxu0 %v400_v6  ;;  %444 = vperm.xlu2 %778, %v440_v25   ;;  %v686_v45 = vld [vmem:[%s1138_s4] sm:$0xff]  ;;  %s502_s10 = scalar_lea.hbm %s1140_s6, %s680_s23  ;;  %s518_s28 = scalar_lea.hbm %s1141_s7, %s680_s23 }
  0x29   : > { %v353_v2 = vld [vmem:[#allocation2] sm:$0xff]  ;;  %s506_s16 = sshll.u32 %s502_s10, 4  ;;  %s806_s23 = scalar_lea.hbm %s1140_s6, 32  ;;  %s507_s16 = int_to_ptr.hbm [resolvable:$true] %s506_s16 }
  0x2a   : > { %v767_v3 = vpack.i.bf16 %v1048_v1, %v353_v2  ;;  %483 = vst [vmem:[#allocation2] sm:$0xff] %v1048_v1  ;;  %s800_s12 = sshra.s32 %s507_s16, 4  ;;  %s801_s12 = int_to_ptr.hbm [resolvable:$true] %s800_s12 }
  0x2b   : > { %s802_s21 = scalar_lea.hbm %s801_s12, 8  ;;  %p807_p5 = scmp.lt.s32.totalorder %s801_s12, %s1140_s6 }
  0x2c   : > { %768 = vrot.lane.b32.xlu0 %v767_v3, %s915_s22  ;;  %s522_s22 = sshll.u32 %s518_s28, 4  ;;  %p803_p1 = scmp.ne.s32.totalorder %s801_s12, %s802_s21  ;;  %s523_s22 = int_to_ptr.hbm [resolvable:$true] %s522_s22 }
  0x2d   : > { %381 = vperm.xlu1 %777, %v377_v9   ;;  %p808_p6 = scmp.lt.s32.totalorder %s806_s23, %s802_s21 }
  0x2e   : > { %p804_p2 = pnand %p803_p1, %p1009_p3 }
  0x2f   : > { %p809_p7 = por %p808_p6, %p807_p5 }
  0x30   : > { %449 = vperm.xlu2 %778, %v441_v28   ;;  %p805_p4 = pneg %p804_p2 }
  0x32   : > { %p810_p9 = pnand %p809_p7, %p805_p4 }
  0x34   : > { %773 = vrot.lane.b32.xlu0 %v767_v3, %s916_s11  ;;  %s485_s11 = scalar_lea.sflag [#allocation4], %s1030_s20 }
  0x82   : > { %v445_v46 = vpop.permute.xlu2 %444 }
  0x8a   : > { %v450_v51 = vpop.permute.xlu2 %449 }
  0x97   : > { %v387_v21 = vpop.permute.xlu1 %386 }
  0x9e   : > { %v769_v10 = vpop.permute.xlu0 %768 }
  0x9f   : > { %v771_v11 = vunpack.i.h.bf16 %v769_v10  ;;  %v770_v12 = vunpack.i.l.bf16 %v769_v10  ;;  %v382_v29 = vpop.permute.xlu1 %381 }
  0xa1   : > { %v363_v16 = vsel %vm362_vm1, %v770_v12, %v771_v11 }
  0xa6   : > { %v774_v13 = vpop.permute.xlu0 %773 }
  0xa7   : > { %v776_v14 = vunpack.i.h.bf16 %v774_v13  ;;  %v775_v15 = vunpack.i.l.bf16 %v774_v13 }
  0xa9   : > { %v371_v17 = vsel %vm370_vm2, %v775_v15, %v776_v14 }
  0xaa   : > { %v375_v18 = vpack.c.bf16 %v371_v17, %v363_v16 }
  0xac   : > { %409 = vmatpush.bf16.msra.mxu0 %v375_v18 }
  0xaf   : > { %670 = vmatmul.msk.bf16.vlgmr.msra.gmra.mxu0 %vm394_vm3, %v685_v19 }
 0x12c   : > { %v411_v20 = vpop.f32.mrf.mxu0 }
 0x12d   : > { %v412_v31 = vadd.f32 %v411_v20, %v382_v29 }
 0x134   : > { %v413_v22 = vpop.f32.mrf.mxu0 }
 0x135   : > { %v414_v23 = vadd.f32 %v413_v22, %v387_v21 }
 0x137   : > { %v671_v24 = vmul.f32 -1.442695, %v414_v23 }
 0x139   : > { %780 = vpow2.f32 %v671_v24 }
 0x13f   : > { %v781_v26 = vpop.eup %780 }
 0x140   : > { %v420_v27 = vadd.f32 1.0, %v781_v26 }
 0x142   : > { %782 = vrcp.f32 %v420_v27  ;;  %v432_v34 = vand.u32 2147483648, %v420_v27  ;;  %v430_v36 = vand.u32 2147483647, %v420_v27  ;;  %vm426_vm5 = vweird.f32 %v420_v27 }
 0x143   : > { %784 = vtanh.f32 %v412_v31 }
 0x144   : > { %v433_v38 = vor.u32 1.1754944e-38, %v432_v34  ;;  %vm431_vm7 = vcmp.eq.f32.partialorder %v430_v36, 8.507059e+37 }
 0x148   : > { %v783_v30 = vpop.eup %782 }
 0x149   : > { %v422_v32 = vmul.f32 %v783_v30, %v420_v27  ;;  %vm427_vm4 = vweird.f32 %v783_v30  ;;  %v785_v40 = vpop.eup %784 }
 0x14a   : > { %vm428_vm6 = vmor %vm426_vm5, %vm427_vm4 }
 0x14b   : > { %v423_v33 = vsub.f32 1.0, %v422_v32 }
 0x14d   : > { %v424_v35 = vmul.f32 %v783_v30, %v423_v33 }
 0x14f   : > { %v425_v37 = vadd.f32 %v783_v30, %v424_v35 }
 0x151   : > { %v429_v39 = vsel %vm428_vm6, %v783_v30, %v425_v37 }
 0x152   : > { %v434_v41 = vsel %vm431_vm7, %v433_v38, %v429_v39 }
 0x153   : > { %v436_v42 = vmul.f32 %v785_v40, %v434_v41 }
 0x155   : > { %v439_v43 = vpack.c.bf16 %v436_v42, %v436_v42 }
 0x157   : > { %v463_v44 = vsel %vm461_vm8, %v439_v43, 0 }
 0x158   : > { %472 = vmatpush.bf16.msra.mxu1 %v463_v44 }
 0x15b   : > { %676 = vmatmul.msk.bf16.vlgmr.msra.gmra.mxu1 %vm457_vm9, %v686_v45 }
 0x1d8   : > { %v474_v47 = vpop.f32.mrf.mxu1 }
 0x1d9   : > { %v475_v48 = vadd.f32 %v474_v47, %v445_v46 }
 0x1db   : > { %v479_v49 = vadd.f32 %v475_v48, %v1048_v1 }
 0x1dd   : > { %v480_v50 = vmul.f32 0.70710677, %v479_v49 }
 0x1df   : > { %481 = vst [vmem:[%s1043_s29] sm:$0xff] %v480_v50 }
 0x1e0   : > { %v476_v52 = vpop.f32.mrf.mxu1 }
 0x1e1   : > { %813 = shalt.err (!%p810_p9)
}
 0x1e2   : > { %687 = dma.vmem_to_hbm [thread:$0]  (%p1009_p3), %s505_s13, 128, %s507_s16, %s485_s11   ;;  %v477_v53 = vadd.f32 %v476_v52, %v450_v51 }
 0x1e3   : > { %s490_s29 = scalar_lea.sflag [#allocation6], %s1030_s20  ;;  %s828_s18 = sshra.s32 %s523_s22, 4  ;;  %s829_s18 = int_to_ptr.hbm [resolvable:$true] %s828_s18 }
 0x1e4   : > { %482 = vst [vmem:[%s1045_s19] sm:$0xff] %v477_v53  ;;  %s830_s28 = scalar_lea.hbm %s829_s18, 8  ;;  %s834_s9 = scalar_lea.hbm %s1141_s7, 32 }
 0x1e5   : > { %p831_p10 = scmp.ne.s32.totalorder %s829_s18, %s830_s28  ;;  %p835_p13 = scmp.lt.s32.totalorder %s829_s18, %s1141_s7 }
 0x1e6   : > { %p836_p0 = scmp.lt.s32.totalorder %s834_s9, %s830_s28 }
 0x1e7   : > { %p832_p11 = pnand %p831_p10, %p1009_p3 }
 0x1e8   : > { %p837_p1 = por %p836_p0, %p835_p13 }
 0x1e9   : > { %p833_p12 = pneg %p832_p11 }
 0x1eb   : > { %p838_p2 = pnand %p837_p1, %p833_p12 }
 0x1ed   : > { %841 = shalt.err (!%p838_p2)
}
 0x1ee   : > { %688 = dma.vmem_to_hbm [thread:$0]  (%p1009_p3), %s521_s27, 128, %s523_s22, %s490_s29  }
 0x1ef PF: > { %p698_p4 = scmp.ge.s32.totalorder %s912_s8, 2  ;;  %s534_s19 = sand.u32 1, %s884_s24  }
 0x1f0   : > { %s535_s20 = scalar_lea.sflag [#allocation4], %s534_s19 }
 0x1f1   : > { %p692_p5 = pnand %p698_p4, %p1018_p8 }
 0x1f3   : > { %p693_p6 = pneg %p692_p5 }
 0x1f5   : > { %875 = dma.done.wait (%p693_p6), %s535_s20, 128  }
 0x1f6   : > { %877 = vsyncadd (%p693_p6), %s535_s20, 4294967168  ;;  %s545_s13 = scalar_lea.sflag [#allocation6], %s534_s19 }
 0x1f7   : > { %879 = dma.done.wait (%p693_p6), %s545_s13, 128  }
 0x1f8   : > { %881 = vsyncadd (%p693_p6), %s545_s13, 4294967168  ;;  %s24_s8 = sadd.s32 1, %s912_s8   ;;  %s1153_s14 = sld [smem:[#allocation13_spill]] }
 0x1f9   : > { %p21_p7 = scmp.ge.s32.totalorder %s24_s8, 6   ;;  %s1154_s27 = sld [smem:[#allocation9_spill]] }
 0x1fa   : > { %s1155_s28 = sld [smem:[#allocation10_spill]]  ;;  %s1158_s24 = smov %s888_s25 }
 0x1fb   : > { %s1156_s29 = sld [smem:[#allocation11_spill]]  ;;  %s1159_s25 = smov %s892_s26 }
 0x1fc   : > { %s1157_s30 = sld [smem:[#allocation12_spill]]  ;;  %23 = sbr.rel (!%p21_p7) target bundleno = 7 (0x7), region = 103 }
 0x1fe   : > { %s1160_s26 = smov %s1153_s14 }
 0x201   :  { %551 = vsyncpa [#allocation4], 1 }
 0x202   :  { %553 = vsyncpa [#allocation4 + $0x1], 1 }
 0x203   :  { %554 = vsyncpa [#allocation6], 1 }
 0x204   :  { %556 = vsyncpa [#allocation6 + $0x1], 1 }

</bundles_post_ra>
